<compile_context>
chip_gen: v5e
topology: v5e:2x2
jax: 0.10.0
libtpu: 0.0.40
codegen_flags: <defaults>
</compile_context>

<pallas_src>
import functools

import jax
import jax.numpy as jnp
from jax import lax
from jax.experimental import pallas as pl
from jax.experimental.pallas import tpu as pltpu


PAD = 128  # lane-aligned zero margin on each side of the flattened spatial axis


# ----------------------------- Pallas kernel --------------------------------

def resblock_kernel(x_ref, w1_ref, b1_ref, w2_ref, b2_ref, mnf_ref, mnl_ref,
                    out_ref, ap_ref, hp_ref, *, W):
    """Fused ResBlock for one image; channels on sublanes, H*W on lanes.

    x_ref  : (Cp, HW)         f32   one image, flattened spatial on lanes
    w1_ref : (9, Cp, Cp)      bf16  conv_01 taps, t = ky*3 + kx
    b1_ref : (Cp, 1)          f32
    w2_ref : (9, Cp, Cp)      bf16  conv_02 taps
    b2_ref : (Cp, 1)          f32
    mnf_ref: (Cp, HW)         f32   0.0 where output col == 0    (kills dx=-1 wrap)
    mnl_ref: (Cp, HW)         f32   0.0 where output col == W-1  (kills dx=+1 wrap)
    out_ref: (Cp, HW)         f32
    ap_ref : (Cp, 2*PAD+HW)   bf16  scratch: x with zero lane margins
    hp_ref : (Cp, 2*PAD+HW)   bf16  scratch: relu(conv1) with zero lane margins
    """
    Cp, HW = x_ref.shape

    x = x_ref[...]                                   # f32, reused for the residual

    # Stage the input with zero margins.  Interior store starts at lane 128
    # (aligned, unmasked); only the two 128-lane margins are zeroed.
    ap_ref[:, :PAD] = jnp.zeros((Cp, PAD), ap_ref.dtype)
    ap_ref[:, PAD + HW:] = jnp.zeros((Cp, PAD), ap_ref.dtype)
    ap_ref[:, PAD:PAD + HW] = x.astype(ap_ref.dtype)

    mnf = mnf_ref[...]
    mnl = mnl_ref[...]

    def conv3x3(src_ref, w_ref):
        # 9 accumulating bf16 MXU dots; out-of-row taps read the zero margins,
        # column wraps are masked after the dot (lane-wise, so exact).
        acc = jnp.zeros((Cp, HW), jnp.float32)
        for dy in (-1, 0, 1):
            for dx in (-1, 0, 1):
                t = (dy + 1) * 3 + (dx + 1)
                start = PAD + dy * W + dx
                tap = src_ref[:, start:start + HW]                   # (Cp, HW) bf16
                part = jnp.dot(w_ref[t], tap,
                               preferred_element_type=jnp.float32)   # (Cp, HW) f32
                if dx == -1:
                    part = part * mnf
                elif dx == 1:
                    part = part * mnl
                acc = acc + part
        return acc

    # ---- conv_01 + bias + ReLU (elementwise math in f32) --------------------
    h = jnp.maximum(conv3x3(ap_ref, w1_ref) + b1_ref[...], 0.0)      # (Cp, HW)

    # Stage the intermediate in bf16 VMEM scratch; no HBM round trip.
    hp_ref[:, :PAD] = jnp.zeros((Cp, PAD), hp_ref.dtype)
    hp_ref[:, PAD + HW:] = jnp.zeros((Cp, PAD), hp_ref.dtype)
    hp_ref[:, PAD:PAD + HW] = h.astype(hp_ref.dtype)

    # ---- conv_02 + bias + residual (residual uses the original f32 x) -------
    y = conv3x3(hp_ref, w2_ref) + b2_ref[...] + x
    out_ref[...] = y.astype(out_ref.dtype)


# ------------------------------ JAX wrapper ----------------------------------

def _round_up(n, m):
    return (n + m - 1) // m * m


@jax.jit
def resblock_forward(x_nchw, w1, b1, w2, b2):
    B, C, H, W = x_nchw.shape
    cout = w1.shape[0]
    assert cout == C, "residual add requires num_features_in == num_features_out"
    assert W + 1 <= PAD, "lane margin must cover the 1-pixel conv halo"

    HW = H * W
    Cp = _round_up(C, 8)          # sublane-multiple channel padding (tiny at C=4)

    # NCHW -> (B, C, H*W) is a free reshape (no HBM halo pad); only the small
    # channel pad 4 -> 8 touches memory.
    x2d = x_nchw.reshape(B, C, HW)
    if Cp != C:
        x2d = jnp.pad(x2d, ((0, 0), (0, Cp - C), (0, 0)))

    def prep_w(w):
        # PyTorch (O, I, 3, 3) -> (9, Cp, Cp) bf16, tap index t = ky*3 + kx.
        o, i = w.shape[0], w.shape[1]
        wt = jnp.transpose(w, (2, 3, 0, 1)).reshape(9, o, i)
        wt = jnp.pad(wt, ((0, 0), (0, Cp - o), (0, Cp - i)))
        return wt.astype(jnp.bfloat16)

    w1t = prep_w(w1)
    w2t = prep_w(w2)
    b1c = jnp.pad(b1, (0, Cp - cout)).reshape(Cp, 1).astype(jnp.float32)
    b2c = jnp.pad(b2, (0, Cp - cout)).reshape(Cp, 1).astype(jnp.float32)

    # Per-lane column-validity masks (constant, DMA'd once).
    col = jnp.arange(HW, dtype=jnp.int32) % W
    m_not_first = jnp.broadcast_to((col != 0).astype(jnp.float32), (Cp, HW))
    m_not_last = jnp.broadcast_to((col != W - 1).astype(jnp.float32), (Cp, HW))

    kernel = functools.partial(resblock_kernel, W=W)

    out2d = pl.pallas_call(
        kernel,
        out_shape=jax.ShapeDtypeStruct((B, Cp, HW), x_nchw.dtype),
        grid_spec=pltpu.PrefetchScalarGridSpec(
            num_scalar_prefetch=0,
            grid=(B,),                                   # one image per grid step
            in_specs=[
                pl.BlockSpec((None, Cp, HW), lambda b: (b, 0, 0)),
                pl.BlockSpec((9, Cp, Cp), lambda b: (0, 0, 0)),
                pl.BlockSpec((Cp, 1), lambda b: (0, 0)),
                pl.BlockSpec((9, Cp, Cp), lambda b: (0, 0, 0)),
                pl.BlockSpec((Cp, 1), lambda b: (0, 0)),
                pl.BlockSpec((Cp, HW), lambda b: (0, 0)),
                pl.BlockSpec((Cp, HW), lambda b: (0, 0)),
            ],
            out_specs=pl.BlockSpec((None, Cp, HW), lambda b: (b, 0, 0)),
            scratch_shapes=[
                pltpu.VMEM((Cp, 2 * PAD + HW), jnp.bfloat16),   # padded input
                pltpu.VMEM((Cp, 2 * PAD + HW), jnp.bfloat16),   # padded relu(conv1)
            ],
        ),
        compiler_params=pltpu.CompilerParams(
            dimension_semantics=("parallel",),           # megacore over batch
            # Budgeted for v7x's 64 MiB/TC (review: keep <= ~48-56 MiB); actual
            # per-step footprint at these shapes is ~100 KiB.  v6e can go higher.
            vmem_limit_bytes=48 * 1024 * 1024,
        ),
    )(x2d, w1t, b1c, w2t, b2c, m_not_first, m_not_last)

    return out2d[:, :C, :].reshape(B, C, H, W)


# ------------------------------ init / reference -----------------------------

def init_resblock_params(key, c_in, c_out):
    """Deterministic init mirroring nn.Conv2d parameter shapes (OIHW weight, (O,) bias)."""
    k1, k2, k3, k4 = jax.random.split(key, 4)
    bound1 = 1.0 / (c_in * 9) ** 0.5
    bound2 = 1.0 / (c_out * 9) ** 0.5
    w1 = jax.random.uniform(k1, (c_out, c_in, 3, 3), jnp.float32, -bound1, bound1)
    b1 = jax.random.uniform(k2, (c_out,), jnp.float32, -bound1, bound1)
    w2 = jax.random.uniform(k3, (c_out, c_out, 3, 3), jnp.float32, -bound2, bound2)
    b2 = jax.random.uniform(k4, (c_out,), jnp.float32, -bound2, bound2)
    return w1, b1, w2, b2


def resblock_reference(x, w1, b1, w2, b2):
    dn = lax.conv_dimension_numbers(x.shape, w1.shape, ('NCHW', 'OIHW', 'NCHW'))
    h = lax.conv_general_dilated(x, w1, (1, 1), ((1, 1), (1, 1)), dimension_numbers=dn)
    h = jnp.maximum(h + b1.reshape(1, -1, 1, 1), 0.0)
    y = lax.conv_general_dilated(h, w2, (1, 1), ((1, 1), (1, 1)), dimension_numbers=dn)
    return y + b2.reshape(1, -1, 1, 1) + x


# -------------------------------- main ----------------------------------------

if __name__ == "__main__":
    key = jax.random.PRNGKey(0)
    kx, kp = jax.random.split(key)

    B, C, H, W = 2, 4, 16, 16
    x = jax.random.normal(kx, (B, C, H, W), jnp.float32)
    w1, b1, w2, b2 = init_resblock_params(kp, C, C)

    out = jax.block_until_ready(resblock_forward(x, w1, b1, w2, b2))

    ref = resblock_reference(x, w1, b1, w2, b2)
    assert out.shape == (B, C, H, W) and out.dtype == jnp.float32
    max_err = float(jnp.max(jnp.abs(out - ref)))
    # bf16 MXU operands with f32 accumulation -> tolerance loosened vs pure f32
    # (per the review's correctness note); structural bugs would show as O(1) errors.
    assert jnp.allclose(out, ref, rtol=5e-2, atol=5e-2), f"max_err={max_err}"

    print("KERNEL_OK")
</pallas_src>

<mosaic_0001>
module attributes {stable_mosaic.version = 11 : i64} {
  func.func @resblock_kernel(%arg0: i32, %arg1: memref<1x8x256xf32, #tpu.memory_space<vmem>>, %arg2: memref<9x8x8xbf16, #tpu.memory_space<vmem>>, %arg3: memref<8x1xf32, #tpu.memory_space<vmem>>, %arg4: memref<9x8x8xbf16, #tpu.memory_space<vmem>>, %arg5: memref<8x1xf32, #tpu.memory_space<vmem>>, %arg6: memref<8x256xf32, #tpu.memory_space<vmem>>, %arg7: memref<8x256xf32, #tpu.memory_space<vmem>>, %arg8: memref<1x8x256xf32, #tpu.memory_space<vmem>>, %arg9: memref<8x512xbf16, #tpu.memory_space<vmem>>, %arg10: memref<8x512xbf16, #tpu.memory_space<vmem>>) attributes {dimension_semantics = [#tpu.dimension_semantics<parallel>], iteration_bounds = array<i64: 2>, scalar_prefetch = 0 : i64, scratch_operands = 2 : i64, tpu.core_type = #tpu.core_type<tc>, window_params = [{transform_indices = @transform_0, window_bounds = array<i64: 1, 8, 256>}, {pipeline_mode = #tpu.pipeline_mode<synchronous>, transform_indices = @transform_1, window_bounds = array<i64: 9, 8, 8>}, {pipeline_mode = #tpu.pipeline_mode<synchronous>, transform_indices = @transform_2, window_bounds = array<i64: 8, 1>}, {pipeline_mode = #tpu.pipeline_mode<synchronous>, transform_indices = @transform_3, window_bounds = array<i64: 9, 8, 8>}, {pipeline_mode = #tpu.pipeline_mode<synchronous>, transform_indices = @transform_4, window_bounds = array<i64: 8, 1>}, {pipeline_mode = #tpu.pipeline_mode<synchronous>, transform_indices = @transform_5, window_bounds = array<i64: 8, 256>}, {pipeline_mode = #tpu.pipeline_mode<synchronous>, transform_indices = @transform_6, window_bounds = array<i64: 8, 256>}, {transform_indices = @transform_7, window_bounds = array<i64: 1, 8, 256>}]} {
    %c0 = arith.constant 0 : index
    %c0_0 = arith.constant 0 : index
    %c0_1 = arith.constant 0 : index
    %0 = vector.load %arg1[%c0, %c0_0, %c0_1] : memref<1x8x256xf32, #tpu.memory_space<vmem>>, vector<1x8x256xf32>
    %1 = vector.shape_cast %0 : vector<1x8x256xf32> to vector<8x256xf32>
    %cst = arith.constant 0.000000e+00 : bf16
    %2 = vector.broadcast %cst : bf16 to vector<8x128xbf16>
    %c0_2 = arith.constant 0 : index
    %c0_3 = arith.constant 0 : index
    %3 = vector.load %arg9[%c0_2, %c0_3] : memref<8x512xbf16, #tpu.memory_space<vmem>>, vector<8x128xbf16>
    tpu.vector_store %arg9[%c0_2, %c0_3], %2 {strides = array<i32>} : memref<8x512xbf16, #tpu.memory_space<vmem>>, vector<8x128xbf16>,
    %cst_4 = arith.constant 0.000000e+00 : bf16
    %4 = vector.broadcast %cst_4 : bf16 to vector<8x128xbf16>
    %c0_5 = arith.constant 0 : index
    %c384 = arith.constant 384 : index
    %5 = vector.load %arg9[%c0_5, %c384] : memref<8x512xbf16, #tpu.memory_space<vmem>>, vector<8x128xbf16>
    tpu.vector_store %arg9[%c0_5, %c384], %4 {strides = array<i32>} : memref<8x512xbf16, #tpu.memory_space<vmem>>, vector<8x128xbf16>,
    %6 = arith.truncf %1 : vector<8x256xf32> to vector<8x256xbf16>
    %c0_6 = arith.constant 0 : index
    %c128 = arith.constant 128 : index
    %7 = vector.load %arg9[%c0_6, %c128] : memref<8x512xbf16, #tpu.memory_space<vmem>>, vector<8x256xbf16>
    tpu.vector_store %arg9[%c0_6, %c128], %6 {strides = array<i32>} : memref<8x512xbf16, #tpu.memory_space<vmem>>, vector<8x256xbf16>,
    %c0_7 = arith.constant 0 : index
    %c0_8 = arith.constant 0 : index
    %8 = vector.load %arg6[%c0_7, %c0_8] : memref<8x256xf32, #tpu.memory_space<vmem>>, vector<8x256xf32>
    %c0_9 = arith.constant 0 : index
    %c0_10 = arith.constant 0 : index
    %9 = vector.load %arg7[%c0_9, %c0_10] : memref<8x256xf32, #tpu.memory_space<vmem>>, vector<8x256xf32>
    %cst_11 = arith.constant 0.000000e+00 : f32
    %10 = vector.broadcast %cst_11 : f32 to vector<8x256xf32>
    %c0_12 = arith.constant 0 : index
    %c111 = arith.constant 111 : index
    %11 = vector.load %arg9[%c0_12, %c111] : memref<8x512xbf16, #tpu.memory_space<vmem>>, vector<8x256xbf16>
    %c0_13 = arith.constant 0 : index
    %c0_14 = arith.constant 0 : index
    %c0_15 = arith.constant 0 : index
    %12 = vector.load %arg2[%c0_13, %c0_14, %c0_15] : memref<9x8x8xbf16, #tpu.memory_space<vmem>>, vector<1x8x8xbf16>
    %13 = vector.shape_cast %12 : vector<1x8x8xbf16> to vector<8x8xbf16>
    %cst_16 = arith.constant dense<0.000000e+00> : vector<8x256xf32>
    %14 = tpu.matmul %13, %11, %cst_16 {dimension_numbers = #tpu.dot_dimension_numbers<[1], [0], [0], [1], [0, 0, 1, 1], [], []>} : vector<8x8xbf16>, vector<8x256xbf16>, vector<8x256xf32> -> vector<8x256xf32>
    %15 = arith.mulf %14, %8 : vector<8x256xf32>
    %16 = arith.addf %10, %15 : vector<8x256xf32>
    %c0_17 = arith.constant 0 : index
    %c112 = arith.constant 112 : index
    %17 = vector.load %arg9[%c0_17, %c112] : memref<8x512xbf16, #tpu.memory_space<vmem>>, vector<8x256xbf16>
    %c1 = arith.constant 1 : index
    %c0_18 = arith.constant 0 : index
    %c0_19 = arith.constant 0 : index
    %18 = vector.load %arg2[%c1, %c0_18, %c0_19] : memref<9x8x8xbf16, #tpu.memory_space<vmem>>, vector<1x8x8xbf16>
    %19 = vector.shape_cast %18 : vector<1x8x8xbf16> to vector<8x8xbf16>
    %cst_20 = arith.constant dense<0.000000e+00> : vector<8x256xf32>
    %20 = tpu.matmul %19, %17, %cst_20 {dimension_numbers = #tpu.dot_dimension_numbers<[1], [0], [0], [1], [0, 0, 1, 1], [], []>} : vector<8x8xbf16>, vector<8x256xbf16>, vector<8x256xf32> -> vector<8x256xf32>
    %21 = arith.addf %16, %20 : vector<8x256xf32>
    %c0_21 = arith.constant 0 : index
    %c113 = arith.constant 113 : index
    %22 = vector.load %arg9[%c0_21, %c113] : memref<8x512xbf16, #tpu.memory_space<vmem>>, vector<8x256xbf16>
    %c2 = arith.constant 2 : index
    %c0_22 = arith.constant 0 : index
    %c0_23 = arith.constant 0 : index
    %23 = vector.load %arg2[%c2, %c0_22, %c0_23] : memref<9x8x8xbf16, #tpu.memory_space<vmem>>, vector<1x8x8xbf16>
    %24 = vector.shape_cast %23 : vector<1x8x8xbf16> to vector<8x8xbf16>
    %cst_24 = arith.constant dense<0.000000e+00> : vector<8x256xf32>
    %25 = tpu.matmul %24, %22, %cst_24 {dimension_numbers = #tpu.dot_dimension_numbers<[1], [0], [0], [1], [0, 0, 1, 1], [], []>} : vector<8x8xbf16>, vector<8x256xbf16>, vector<8x256xf32> -> vector<8x256xf32>
    %26 = arith.mulf %25, %9 : vector<8x256xf32>
    %27 = arith.addf %21, %26 : vector<8x256xf32>
    %c0_25 = arith.constant 0 : index
    %c127 = arith.constant 127 : index
    %28 = vector.load %arg9[%c0_25, %c127] : memref<8x512xbf16, #tpu.memory_space<vmem>>, vector<8x256xbf16>
    %c3 = arith.constant 3 : index
    %c0_26 = arith.constant 0 : index
    %c0_27 = arith.constant 0 : index
    %29 = vector.load %arg2[%c3, %c0_26, %c0_27] : memref<9x8x8xbf16, #tpu.memory_space<vmem>>, vector<1x8x8xbf16>
    %30 = vector.shape_cast %29 : vector<1x8x8xbf16> to vector<8x8xbf16>
    %cst_28 = arith.constant dense<0.000000e+00> : vector<8x256xf32>
    %31 = tpu.matmul %30, %28, %cst_28 {dimension_numbers = #tpu.dot_dimension_numbers<[1], [0], [0], [1], [0, 0, 1, 1], [], []>} : vector<8x8xbf16>, vector<8x256xbf16>, vector<8x256xf32> -> vector<8x256xf32>
    %32 = arith.mulf %31, %8 : vector<8x256xf32>
    %33 = arith.addf %27, %32 : vector<8x256xf32>
    %c0_29 = arith.constant 0 : index
    %c128_30 = arith.constant 128 : index
    %34 = vector.load %arg9[%c0_29, %c128_30] : memref<8x512xbf16, #tpu.memory_space<vmem>>, vector<8x256xbf16>
    %c4 = arith.constant 4 : index
    %c0_31 = arith.constant 0 : index
    %c0_32 = arith.constant 0 : index
    %35 = vector.load %arg2[%c4, %c0_31, %c0_32] : memref<9x8x8xbf16, #tpu.memory_space<vmem>>, vector<1x8x8xbf16>
    %36 = vector.shape_cast %35 : vector<1x8x8xbf16> to vector<8x8xbf16>
    %cst_33 = arith.constant dense<0.000000e+00> : vector<8x256xf32>
    %37 = tpu.matmul %36, %34, %cst_33 {dimension_numbers = #tpu.dot_dimension_numbers<[1], [0], [0], [1], [0, 0, 1, 1], [], []>} : vector<8x8xbf16>, vector<8x256xbf16>, vector<8x256xf32> -> vector<8x256xf32>
    %38 = arith.addf %33, %37 : vector<8x256xf32>
    %c0_34 = arith.constant 0 : index
    %c129 = arith.constant 129 : index
    %39 = vector.load %arg9[%c0_34, %c129] : memref<8x512xbf16, #tpu.memory_space<vmem>>, vector<8x256xbf16>
    %c5 = arith.constant 5 : index
    %c0_35 = arith.constant 0 : index
    %c0_36 = arith.constant 0 : index
    %40 = vector.load %arg2[%c5, %c0_35, %c0_36] : memref<9x8x8xbf16, #tpu.memory_space<vmem>>, vector<1x8x8xbf16>
    %41 = vector.shape_cast %40 : vector<1x8x8xbf16> to vector<8x8xbf16>
    %cst_37 = arith.constant dense<0.000000e+00> : vector<8x256xf32>
    %42 = tpu.matmul %41, %39, %cst_37 {dimension_numbers = #tpu.dot_dimension_numbers<[1], [0], [0], [1], [0, 0, 1, 1], [], []>} : vector<8x8xbf16>, vector<8x256xbf16>, vector<8x256xf32> -> vector<8x256xf32>
    %43 = arith.mulf %42, %9 : vector<8x256xf32>
    %44 = arith.addf %38, %43 : vector<8x256xf32>
    %c0_38 = arith.constant 0 : index
    %c143 = arith.constant 143 : index
    %45 = vector.load %arg9[%c0_38, %c143] : memref<8x512xbf16, #tpu.memory_space<vmem>>, vector<8x256xbf16>
    %c6 = arith.constant 6 : index
    %c0_39 = arith.constant 0 : index
    %c0_40 = arith.constant 0 : index
    %46 = vector.load %arg2[%c6, %c0_39, %c0_40] : memref<9x8x8xbf16, #tpu.memory_space<vmem>>, vector<1x8x8xbf16>
    %47 = vector.shape_cast %46 : vector<1x8x8xbf16> to vector<8x8xbf16>
    %cst_41 = arith.constant dense<0.000000e+00> : vector<8x256xf32>
    %48 = tpu.matmul %47, %45, %cst_41 {dimension_numbers = #tpu.dot_dimension_numbers<[1], [0], [0], [1], [0, 0, 1, 1], [], []>} : vector<8x8xbf16>, vector<8x256xbf16>, vector<8x256xf32> -> vector<8x256xf32>
    %49 = arith.mulf %48, %8 : vector<8x256xf32>
    %50 = arith.addf %44, %49 : vector<8x256xf32>
    %c0_42 = arith.constant 0 : index
    %c144 = arith.constant 144 : index
    %51 = vector.load %arg9[%c0_42, %c144] : memref<8x512xbf16, #tpu.memory_space<vmem>>, vector<8x256xbf16>
    %c7 = arith.constant 7 : index
    %c0_43 = arith.constant 0 : index
    %c0_44 = arith.constant 0 : index
    %52 = vector.load %arg2[%c7, %c0_43, %c0_44] : memref<9x8x8xbf16, #tpu.memory_space<vmem>>, vector<1x8x8xbf16>
    %53 = vector.shape_cast %52 : vector<1x8x8xbf16> to vector<8x8xbf16>
    %cst_45 = arith.constant dense<0.000000e+00> : vector<8x256xf32>
    %54 = tpu.matmul %53, %51, %cst_45 {dimension_numbers = #tpu.dot_dimension_numbers<[1], [0], [0], [1], [0, 0, 1, 1], [], []>} : vector<8x8xbf16>, vector<8x256xbf16>, vector<8x256xf32> -> vector<8x256xf32>
    %55 = arith.addf %50, %54 : vector<8x256xf32>
    %c0_46 = arith.constant 0 : index
    %c145 = arith.constant 145 : index
    %56 = vector.load %arg9[%c0_46, %c145] : memref<8x512xbf16, #tpu.memory_space<vmem>>, vector<8x256xbf16>
    %c8 = arith.constant 8 : index
    %c0_47 = arith.constant 0 : index
    %c0_48 = arith.constant 0 : index
    %57 = vector.load %arg2[%c8, %c0_47, %c0_48] : memref<9x8x8xbf16, #tpu.memory_space<vmem>>, vector<1x8x8xbf16>
    %58 = vector.shape_cast %57 : vector<1x8x8xbf16> to vector<8x8xbf16>
    %cst_49 = arith.constant dense<0.000000e+00> : vector<8x256xf32>
    %59 = tpu.matmul %58, %56, %cst_49 {dimension_numbers = #tpu.dot_dimension_numbers<[1], [0], [0], [1], [0, 0, 1, 1], [], []>} : vector<8x8xbf16>, vector<8x256xbf16>, vector<8x256xf32> -> vector<8x256xf32>
    %60 = arith.mulf %59, %9 : vector<8x256xf32>
    %61 = arith.addf %55, %60 : vector<8x256xf32>
    %c0_50 = arith.constant 0 : index
    %c0_51 = arith.constant 0 : index
    %62 = vector.load %arg3[%c0_50, %c0_51] : memref<8x1xf32, #tpu.memory_space<vmem>>, vector<8x1xf32>
    %63 = vector.broadcast %62 : vector<8x1xf32> to vector<8x256xf32>
    %64 = arith.addf %61, %63 : vector<8x256xf32>
    %cst_52 = arith.constant 0.000000e+00 : f32
    %65 = vector.broadcast %cst_52 : f32 to vector<8x256xf32>
    %66 = arith.maximumf %64, %65 : vector<8x256xf32>
    %cst_53 = arith.constant 0.000000e+00 : bf16
    %67 = vector.broadcast %cst_53 : bf16 to vector<8x128xbf16>
    %c0_54 = arith.constant 0 : index
    %c0_55 = arith.constant 0 : index
    %68 = vector.load %arg10[%c0_54, %c0_55] : memref<8x512xbf16, #tpu.memory_space<vmem>>, vector<8x128xbf16>
    tpu.vector_store %arg10[%c0_54, %c0_55], %67 {strides = array<i32>} : memref<8x512xbf16, #tpu.memory_space<vmem>>, vector<8x128xbf16>,
    %cst_56 = arith.constant 0.000000e+00 : bf16
    %69 = vector.broadcast %cst_56 : bf16 to vector<8x128xbf16>
    %c0_57 = arith.constant 0 : index
    %c384_58 = arith.constant 384 : index
    %70 = vector.load %arg10[%c0_57, %c384_58] : memref<8x512xbf16, #tpu.memory_space<vmem>>, vector<8x128xbf16>
    tpu.vector_store %arg10[%c0_57, %c384_58], %69 {strides = array<i32>} : memref<8x512xbf16, #tpu.memory_space<vmem>>, vector<8x128xbf16>,
    %71 = arith.truncf %66 : vector<8x256xf32> to vector<8x256xbf16>
    %c0_59 = arith.constant 0 : index
    %c128_60 = arith.constant 128 : index
    %72 = vector.load %arg10[%c0_59, %c128_60] : memref<8x512xbf16, #tpu.memory_space<vmem>>, vector<8x256xbf16>
    tpu.vector_store %arg10[%c0_59, %c128_60], %71 {strides = array<i32>} : memref<8x512xbf16, #tpu.memory_space<vmem>>, vector<8x256xbf16>,
    %cst_61 = arith.constant 0.000000e+00 : f32
    %73 = vector.broadcast %cst_61 : f32 to vector<8x256xf32>
    %c0_62 = arith.constant 0 : index
    %c111_63 = arith.constant 111 : index
    %74 = vector.load %arg10[%c0_62, %c111_63] : memref<8x512xbf16, #tpu.memory_space<vmem>>, vector<8x256xbf16>
    %c0_64 = arith.constant 0 : index
    %c0_65 = arith.constant 0 : index
    %c0_66 = arith.constant 0 : index
    %75 = vector.load %arg4[%c0_64, %c0_65, %c0_66] : memref<9x8x8xbf16, #tpu.memory_space<vmem>>, vector<1x8x8xbf16>
    %76 = vector.shape_cast %75 : vector<1x8x8xbf16> to vector<8x8xbf16>
    %cst_67 = arith.constant dense<0.000000e+00> : vector<8x256xf32>
    %77 = tpu.matmul %76, %74, %cst_67 {dimension_numbers = #tpu.dot_dimension_numbers<[1], [0], [0], [1], [0, 0, 1, 1], [], []>} : vector<8x8xbf16>, vector<8x256xbf16>, vector<8x256xf32> -> vector<8x256xf32>
    %78 = arith.mulf %77, %8 : vector<8x256xf32>
    %79 = arith.addf %73, %78 : vector<8x256xf32>
    %c0_68 = arith.constant 0 : index
    %c112_69 = arith.constant 112 : index
    %80 = vector.load %arg10[%c0_68, %c112_69] : memref<8x512xbf16, #tpu.memory_space<vmem>>, vector<8x256xbf16>
    %c1_70 = arith.constant 1 : index
    %c0_71 = arith.constant 0 : index
    %c0_72 = arith.constant 0 : index
    %81 = vector.load %arg4[%c1_70, %c0_71, %c0_72] : memref<9x8x8xbf16, #tpu.memory_space<vmem>>, vector<1x8x8xbf16>
    %82 = vector.shape_cast %81 : vector<1x8x8xbf16> to vector<8x8xbf16>
    %cst_73 = arith.constant dense<0.000000e+00> : vector<8x256xf32>
    %83 = tpu.matmul %82, %80, %cst_73 {dimension_numbers = #tpu.dot_dimension_numbers<[1], [0], [0], [1], [0, 0, 1, 1], [], []>} : vector<8x8xbf16>, vector<8x256xbf16>, vector<8x256xf32> -> vector<8x256xf32>
    %84 = arith.addf %79, %83 : vector<8x256xf32>
    %c0_74 = arith.constant 0 : index
    %c113_75 = arith.constant 113 : index
    %85 = vector.load %arg10[%c0_74, %c113_75] : memref<8x512xbf16, #tpu.memory_space<vmem>>, vector<8x256xbf16>
    %c2_76 = arith.constant 2 : index
    %c0_77 = arith.constant 0 : index
    %c0_78 = arith.constant 0 : index
    %86 = vector.load %arg4[%c2_76, %c0_77, %c0_78] : memref<9x8x8xbf16, #tpu.memory_space<vmem>>, vector<1x8x8xbf16>
    %87 = vector.shape_cast %86 : vector<1x8x8xbf16> to vector<8x8xbf16>
    %cst_79 = arith.constant dense<0.000000e+00> : vector<8x256xf32>
    %88 = tpu.matmul %87, %85, %cst_79 {dimension_numbers = #tpu.dot_dimension_numbers<[1], [0], [0], [1], [0, 0, 1, 1], [], []>} : vector<8x8xbf16>, vector<8x256xbf16>, vector<8x256xf32> -> vector<8x256xf32>
    %89 = arith.mulf %88, %9 : vector<8x256xf32>
    %90 = arith.addf %84, %89 : vector<8x256xf32>
    %c0_80 = arith.constant 0 : index
    %c127_81 = arith.constant 127 : index
    %91 = vector.load %arg10[%c0_80, %c127_81] : memref<8x512xbf16, #tpu.memory_space<vmem>>, vector<8x256xbf16>
    %c3_82 = arith.constant 3 : index
    %c0_83 = arith.constant 0 : index
    %c0_84 = arith.constant 0 : index
    %92 = vector.load %arg4[%c3_82, %c0_83, %c0_84] : memref<9x8x8xbf16, #tpu.memory_space<vmem>>, vector<1x8x8xbf16>
    %93 = vector.shape_cast %92 : vector<1x8x8xbf16> to vector<8x8xbf16>
    %cst_85 = arith.constant dense<0.000000e+00> : vector<8x256xf32>
    %94 = tpu.matmul %93, %91, %cst_85 {dimension_numbers = #tpu.dot_dimension_numbers<[1], [0], [0], [1], [0, 0, 1, 1], [], []>} : vector<8x8xbf16>, vector<8x256xbf16>, vector<8x256xf32> -> vector<8x256xf32>
    %95 = arith.mulf %94, %8 : vector<8x256xf32>
    %96 = arith.addf %90, %95 : vector<8x256xf32>
    %c0_86 = arith.constant 0 : index
    %c128_87 = arith.constant 128 : index
    %97 = vector.load %arg10[%c0_86, %c128_87] : memref<8x512xbf16, #tpu.memory_space<vmem>>, vector<8x256xbf16>
    %c4_88 = arith.constant 4 : index
    %c0_89 = arith.constant 0 : index
    %c0_90 = arith.constant 0 : index
    %98 = vector.load %arg4[%c4_88, %c0_89, %c0_90] : memref<9x8x8xbf16, #tpu.memory_space<vmem>>, vector<1x8x8xbf16>
    %99 = vector.shape_cast %98 : vector<1x8x8xbf16> to vector<8x8xbf16>
    %cst_91 = arith.constant dense<0.000000e+00> : vector<8x256xf32>
    %100 = tpu.matmul %99, %97, %cst_91 {dimension_numbers = #tpu.dot_dimension_numbers<[1], [0], [0], [1], [0, 0, 1, 1], [], []>} : vector<8x8xbf16>, vector<8x256xbf16>, vector<8x256xf32> -> vector<8x256xf32>
    %101 = arith.addf %96, %100 : vector<8x256xf32>
    %c0_92 = arith.constant 0 : index
    %c129_93 = arith.constant 129 : index
    %102 = vector.load %arg10[%c0_92, %c129_93] : memref<8x512xbf16, #tpu.memory_space<vmem>>, vector<8x256xbf16>
    %c5_94 = arith.constant 5 : index
    %c0_95 = arith.constant 0 : index
    %c0_96 = arith.constant 0 : index
    %103 = vector.load %arg4[%c5_94, %c0_95, %c0_96] : memref<9x8x8xbf16, #tpu.memory_space<vmem>>, vector<1x8x8xbf16>
    %104 = vector.shape_cast %103 : vector<1x8x8xbf16> to vector<8x8xbf16>
    %cst_97 = arith.constant dense<0.000000e+00> : vector<8x256xf32>
    %105 = tpu.matmul %104, %102, %cst_97 {dimension_numbers = #tpu.dot_dimension_numbers<[1], [0], [0], [1], [0, 0, 1, 1], [], []>} : vector<8x8xbf16>, vector<8x256xbf16>, vector<8x256xf32> -> vector<8x256xf32>
    %106 = arith.mulf %105, %9 : vector<8x256xf32>
    %107 = arith.addf %101, %106 : vector<8x256xf32>
    %c0_98 = arith.constant 0 : index
    %c143_99 = arith.constant 143 : index
    %108 = vector.load %arg10[%c0_98, %c143_99] : memref<8x512xbf16, #tpu.memory_space<vmem>>, vector<8x256xbf16>
    %c6_100 = arith.constant 6 : index
    %c0_101 = arith.constant 0 : index
    %c0_102 = arith.constant 0 : index
    %109 = vector.load %arg4[%c6_100, %c0_101, %c0_102] : memref<9x8x8xbf16, #tpu.memory_space<vmem>>, vector<1x8x8xbf16>
    %110 = vector.shape_cast %109 : vector<1x8x8xbf16> to vector<8x8xbf16>
    %cst_103 = arith.constant dense<0.000000e+00> : vector<8x256xf32>
    %111 = tpu.matmul %110, %108, %cst_103 {dimension_numbers = #tpu.dot_dimension_numbers<[1], [0], [0], [1], [0, 0, 1, 1], [], []>} : vector<8x8xbf16>, vector<8x256xbf16>, vector<8x256xf32> -> vector<8x256xf32>
    %112 = arith.mulf %111, %8 : vector<8x256xf32>
    %113 = arith.addf %107, %112 : vector<8x256xf32>
    %c0_104 = arith.constant 0 : index
    %c144_105 = arith.constant 144 : index
    %114 = vector.load %arg10[%c0_104, %c144_105] : memref<8x512xbf16, #tpu.memory_space<vmem>>, vector<8x256xbf16>
    %c7_106 = arith.constant 7 : index
    %c0_107 = arith.constant 0 : index
    %c0_108 = arith.constant 0 : index
    %115 = vector.load %arg4[%c7_106, %c0_107, %c0_108] : memref<9x8x8xbf16, #tpu.memory_space<vmem>>, vector<1x8x8xbf16>
    %116 = vector.shape_cast %115 : vector<1x8x8xbf16> to vector<8x8xbf16>
    %cst_109 = arith.constant dense<0.000000e+00> : vector<8x256xf32>
    %117 = tpu.matmul %116, %114, %cst_109 {dimension_numbers = #tpu.dot_dimension_numbers<[1], [0], [0], [1], [0, 0, 1, 1], [], []>} : vector<8x8xbf16>, vector<8x256xbf16>, vector<8x256xf32> -> vector<8x256xf32>
    %118 = arith.addf %113, %117 : vector<8x256xf32>
    %c0_110 = arith.constant 0 : index
    %c145_111 = arith.constant 145 : index
    %119 = vector.load %arg10[%c0_110, %c145_111] : memref<8x512xbf16, #tpu.memory_space<vmem>>, vector<8x256xbf16>
    %c8_112 = arith.constant 8 : index
    %c0_113 = arith.constant 0 : index
    %c0_114 = arith.constant 0 : index
    %120 = vector.load %arg4[%c8_112, %c0_113, %c0_114] : memref<9x8x8xbf16, #tpu.memory_space<vmem>>, vector<1x8x8xbf16>
    %121 = vector.shape_cast %120 : vector<1x8x8xbf16> to vector<8x8xbf16>
    %cst_115 = arith.constant dense<0.000000e+00> : vector<8x256xf32>
    %122 = tpu.matmul %121, %119, %cst_115 {dimension_numbers = #tpu.dot_dimension_numbers<[1], [0], [0], [1], [0, 0, 1, 1], [], []>} : vector<8x8xbf16>, vector<8x256xbf16>, vector<8x256xf32> -> vector<8x256xf32>
    %123 = arith.mulf %122, %9 : vector<8x256xf32>
    %124 = arith.addf %118, %123 : vector<8x256xf32>
    %c0_116 = arith.constant 0 : index
    %c0_117 = arith.constant 0 : index
    %125 = vector.load %arg5[%c0_116, %c0_117] : memref<8x1xf32, #tpu.memory_space<vmem>>, vector<8x1xf32>
    %126 = vector.broadcast %125 : vector<8x1xf32> to vector<8x256xf32>
    %127 = arith.addf %124, %126 : vector<8x256xf32>
    %128 = arith.addf %127, %1 : vector<8x256xf32>
    %c0_118 = arith.constant 0 : index
    %c0_119 = arith.constant 0 : index
    %c0_120 = arith.constant 0 : index
    %129 = vector.load %arg8[%c0_118, %c0_119, %c0_120] : memref<1x8x256xf32, #tpu.memory_space<vmem>>, vector<1x8x256xf32>
    %130 = vector.shape_cast %129 : vector<1x8x256xf32> to vector<8x256xf32>
    %131 = vector.shape_cast %128 : vector<8x256xf32> to vector<1x8x256xf32>
    tpu.vector_store %arg8[%c0_118, %c0_119, %c0_120], %131 {strides = array<i32>} : memref<1x8x256xf32, #tpu.memory_space<vmem>>, vector<1x8x256xf32>,
    return
  }
  func.func @transform_0(%arg0: i32) -> (i32, i32, i32) {
    %c0_i32 = arith.constant 0 : i32
    %c0_i32_0 = arith.constant 0 : i32
    %c0_i32_1 = arith.constant 0 : i32
    return %arg0, %c0_i32, %c0_i32_0 : i32, i32, i32
  }
  func.func @transform_1(%arg0: i32) -> (i32, i32, i32) {
    %c0_i32 = arith.constant 0 : i32
    %c0_i32_0 = arith.constant 0 : i32
    %c0_i32_1 = arith.constant 0 : i32
    %c0_i32_2 = arith.constant 0 : i32
    return %c0_i32, %c0_i32_0, %c0_i32_1 : i32, i32, i32
  }
  func.func @transform_2(%arg0: i32) -> (i32, i32) {
    %c0_i32 = arith.constant 0 : i32
    %c0_i32_0 = arith.constant 0 : i32
    %c0_i32_1 = arith.constant 0 : i32
    return %c0_i32, %c0_i32_0 : i32, i32
  }
  func.func @transform_3(%arg0: i32) -> (i32, i32, i32) {
    %c0_i32 = arith.constant 0 : i32
    %c0_i32_0 = arith.constant 0 : i32
    %c0_i32_1 = arith.constant 0 : i32
    %c0_i32_2 = arith.constant 0 : i32
    return %c0_i32, %c0_i32_0, %c0_i32_1 : i32, i32, i32
  }
  func.func @transform_4(%arg0: i32) -> (i32, i32) {
    %c0_i32 = arith.constant 0 : i32
    %c0_i32_0 = arith.constant 0 : i32
    %c0_i32_1 = arith.constant 0 : i32
    return %c0_i32, %c0_i32_0 : i32, i32
  }
  func.func @transform_5(%arg0: i32) -> (i32, i32) {
    %c0_i32 = arith.constant 0 : i32
    %c0_i32_0 = arith.constant 0 : i32
    %c0_i32_1 = arith.constant 0 : i32
    return %c0_i32, %c0_i32_0 : i32, i32
  }
  func.func @transform_6(%arg0: i32) -> (i32, i32) {
    %c0_i32 = arith.constant 0 : i32
    %c0_i32_0 = arith.constant 0 : i32
    %c0_i32_1 = arith.constant 0 : i32
    return %c0_i32, %c0_i32_0 : i32, i32
  }
  func.func @transform_7(%arg0: i32) -> (i32, i32, i32) {
    %c0_i32 = arith.constant 0 : i32
    %c0_i32_0 = arith.constant 0 : i32
    %c0_i32_1 = arith.constant 0 : i32
    return %arg0, %c0_i32, %c0_i32_0 : i32, i32, i32
  }
}

</mosaic_0001>

<bundles_post_ra>
// kernel: resblock_forward.1
= control target key start
LH: loop header
LB: loop body
LE: loop exit
PB: predicated region body
PF: predicated region fallthrough
CT: control target
= control target key end

     0   :  { %s1426_s24 = smov 0   ;;  %s1714_s0 = inlined_call_operand.vmem [shape: f32[2,8,256], index: 0, kind: input, shape index: {}]   ;;  %s1715_s1 = inlined_call_operand.vmem [shape: bf16[9,8,8], index: 1, kind: input, shape index: {}]   ;;  %s1716_s2 = inlined_call_operand.vmem [shape: f32[8,1], index: 2, kind: input, shape index: {}]   ;;  %s1717_s3 = inlined_call_operand.vmem [shape: bf16[9,8,8], index: 3, kind: input, shape index: {}]   ;;  %s1718_s4 = inlined_call_operand.vmem [shape: f32[8,1], index: 4, kind: input, shape index: {}]   ;;  %s1719_s5 = inlined_call_operand.vmem [shape: f32[8,256], index: 5, kind: input, shape index: {}]   ;;  %s1720_s6 = inlined_call_operand.vmem [shape: f32[8,256], index: 6, kind: input, shape index: {}]   ;;  %s1721_s7 = inlined_call_operand.vmem [shape: f32[2,8,256], index: 7, kind: output, shape index: {}]  }
   0x1 LB: > { %s1285_s25 = sadd.s32 4294967295, %s1375_s24   ;;  %p1289_p0 = scmp.ge.s32.totalorder %s1375_s24, 1  ;;  %s1375_s24 = sphi %s1426_s24, %s17_s24  }
   0x2   : > { %p237_p1 = scmp.lt.s32.totalorder %s1375_s24, 3 }
   0x4   : > { %p238_p2 = pnand %p1289_p0, %p237_p1 }
   0x5   : > { %p269_p3 = scmp.lt.s32.totalorder (!%p238_p2), %s1285_s25, 1  ;;  %s1378_s30 = smov (!%p238_p2), 17  }
   0x6   : > { %241 = sbr.rel (%p238_p2) target bundleno = 703 (0x2bf), region = 48  ;;  %s1379_s8 = smov (!%p238_p2), 16  }
   0x7   : > { %s1380_s9 = smov (!%p238_p2), 15   ;;  %s1381_s10 = smov (!%p238_p2), 1  }
   0x8   : > { %s1382_s11 = smov (!%p238_p2), 127   ;;  %s1383_s12 = smov (!%p238_p2), 113  }
   0x9   : > { %s1384_s13 = smov (!%p238_p2), 112   ;;  %s1385_s14 = smov (!%p238_p2), 111  }
   0xb   : > { %v1377_v0 = vmov 0   ;;  %s1723_s25 = smov (!%p269_p3, %s1285_s25), 1  ;;  %vm359_vm0 = vcmask 130048   ;;  %vm314_vm1 = vcmask 1043456   ;;  %vm310_vm2 = vcmask 64512  }
   0xc   : > { %282 = vst [vmem:[#allocation2] sm:$0xf] %v1377_v0  ;;  %1367 = vset.pattern.permute.xlu0 %v1377_v0  ;;  %1368 = vset.pattern.permute.xlu2 %v1377_v0  ;;  %s1348_s26 = sshll.u32 %s1723_s25, 4  ;;  %v1296_v23 = vld [vmem:[%s1715_s1 + $0x4] sm:$0xf]  ;;  %vm307_vm3 = vcmask 138240  }
   0xd   : > { %283 = vst [vmem:[#allocation2 + $0xc] sm:$0xf] %v1377_v0  ;;  %s273_s29 = scalar_lea.vmem %s1714_s0, %s1348_s26  ;;  %v292_v35 = vld [vmem:[%s1715_s1] sm:$0xf]  ;;  %vm407_vm4 = vcmask 121856   ;;  %vm457_vm5 = vcmask 7168  }
   0xe   : > { %762 = vst [vmem:[#allocation3] sm:$0xf] %v1377_v0  ;;  %v1442_v1 = vld [vmem:[%s273_s29] sm:$0xff]  ;;  %v1444_v2 = vld [vmem:[%s273_s29 + $0x8] sm:$0xff]  ;;  %vm562_vm6 = vcmask 1039360   ;;  %vm612_vm7 = vcmask 924672  }
   0xf   : > { %763 = vst [vmem:[#allocation3 + $0xc] sm:$0xf] %v1377_v0  ;;  %v284_v3 = vpack.c.bf16 %v1444_v2, %v1442_v1  ;;  %v1299_v52 = vld [vmem:[%s1715_s1 + $0x8] sm:$0xf]  ;;  %v1302_v53 = vld [vmem:[%s1715_s1 + $0xc] sm:$0xf] }
  0x10   : > { %vm662_vm8 = vcmask 916480   ;;  %vm710_vm9 = vcmask 908288  }
  0x11   : > { %285 = vst [vmem:[#allocation2 + $0x4] sm:$0xff] %v284_v3  ;;  %v551_v13 = vunpack.c.h.b16 %v284_v3  ;;  %v550_v14 = vunpack.c.l.b16 %v284_v3 }
  0x13   : > { %v554_v16 = vpack.c.b16 %v551_v13, %v551_v13  ;;  %v553_v17 = vpack.c.b16 %v550_v14, %v550_v14 }
  0x14   : > { %v545_v12 = vld [vmem:[#allocation2 + $0xc] sm:$0xf] }
  0x15   : > { %v552_v15 = vunpack.c.l.b16 %v545_v12  ;;  %v511_v40 = vsel %vm314_vm1, %v553_v17, 0  ;;  %v514_v41 = vsel %vm314_vm1, %v554_v16, 0 }
  0x17   : > { %v555_v18 = vpack.c.b16 %v552_v15, %v552_v15 }
  0x18   : > { %v291_v4 = vld [vmem:[#allocation2 + $0x8] sm:$0xf]  ;;  %v290_v5 = vld [vmem:[#allocation2] sm:$0xff] }
  0x19   : > { %v297_v6 = vunpack.c.l.b16 %v291_v4  ;;  %v295_v7 = vunpack.c.l.b16 %v290_v5  ;;  %v296_v8 = vunpack.c.h.b16 %v290_v5  ;;  %v1305_v5 = vld [vmem:[%s1715_s1 + $0x10] sm:$0xf] }
  0x1b   : > { %v300_v9 = vpack.c.b16 %v297_v6, %v297_v6  ;;  %v298_v10 = vpack.c.b16 %v295_v7, %v295_v7  ;;  %v299_v11 = vpack.c.b16 %v296_v8, %v296_v8  ;;  %v1308_v6 = vld [vmem:[%s1715_s1 + $0x14] sm:$0xf]  ;;  %v752_v8 = vld [vmem:[%s1716_s2] sm:$0xff] }
  0x1d   : > { %305 = vrot.lane.b32.xlu1 %v300_v9, %s1378_s30  ;;  %301 = vrot.lane.b32.xlu0 %v298_v10, %s1378_s30 }
  0x1e   : > { %355 = vrot.lane.b32.xlu2 %v299_v11, %s1379_s8 }
  0x25   : > { %353 = vrot.lane.b32.xlu1 %v298_v10, %s1379_s8  ;;  %303 = vrot.lane.b32.xlu0 %v299_v11, %s1378_s30 }
  0x26   : > { %357 = vrot.lane.b32.xlu2 %v300_v9, %s1379_s8 }
  0x2d   : > { %403 = vrot.lane.b32.xlu1 %v299_v11, %s1380_s9  ;;  %401 = vrot.lane.b32.xlu0 %v298_v10, %s1380_s9 }
  0x2e   : > { %405 = vrot.lane.b32.xlu2 %v300_v9, %s1380_s9 }
  0x35   : > { %453 = vrot.lane.b32.xlu1 %v299_v11, %s1381_s10  ;;  %451 = vrot.lane.b32.xlu0 %v298_v10, %s1381_s10 }
  0x36   : > { %455 = vrot.lane.b32.xlu2 %v300_v9, %s1381_s10 }
  0x3d   : > { %558 = vrot.lane.b32.xlu1 %v554_v16, %s1382_s11  ;;  %556 = vrot.lane.b32.xlu0 %v553_v17, %s1382_s11 }
  0x3e   : > { %560 = vrot.lane.b32.xlu2 %v555_v18, %s1382_s11 }
  0x45   : > { %608 = vrot.lane.b32.xlu1 %v554_v16, %s1383_s12  ;;  %606 = vrot.lane.b32.xlu0 %v553_v17, %s1383_s12 }
  0x46   : > { %610 = vrot.lane.b32.xlu2 %v555_v18, %s1383_s12 }
  0x4d   : > { %658 = vrot.lane.b32.xlu1 %v554_v16, %s1384_s13  ;;  %656 = vrot.lane.b32.xlu0 %v553_v17, %s1384_s13 }
  0x4e   : > { %660 = vrot.lane.b32.xlu2 %v555_v18, %s1384_s13 }
  0x55   : > { %706 = vrot.lane.b32.xlu1 %v554_v16, %s1385_s14  ;;  %704 = vrot.lane.b32.xlu0 %v553_v17, %s1385_s14 }
  0x56   : > { %708 = vrot.lane.b32.xlu2 %v555_v18, %s1385_s14 }
  0x5d   : > { %755 = vperm.xlu0 %1367, %v752_v8  }
  0x78   : > { %v356_v19 = vpop.permute.xlu2 %355 }
  0x80   : > { %v358_v20 = vpop.permute.xlu2 %357 }
  0x81   : > { %v361_v21 = vsel %vm359_vm0, %v356_v19, %v358_v20 }
  0x82   : > { %v369_v22 = vsel %vm314_vm1, %v361_v21, 0 }
  0x83   : > { %391 = vmatpush.bf16.msra.mxu3 %v369_v22  ;;  %v1311_v22 = vld [vmem:[%s1715_s1 + $0x18] sm:$0xf] }
  0x86   : > { %1298 = vmatmul.msk.bf16.vlgmr.msra.gmra.mxu3 %vm310_vm2, %v1296_v23 }
  0x88   : > { %v406_v26 = vpop.permute.xlu2 %405 }
  0x8f   : > { %v306_v24 = vpop.permute.xlu1 %305  ;;  %v302_v25 = vpop.permute.xlu0 %301 }
  0x90   : > { %v456_v42 = vpop.permute.xlu2 %455 }
  0x97   : > { %v354_v27 = vpop.permute.xlu1 %353  ;;  %v304_v28 = vpop.permute.xlu0 %303 }
  0x98   : > { %v308_v29 = vsel %vm307_vm3, %v302_v25, %v304_v28  ;;  %v309_v30 = vsel %vm307_vm3, %v304_v28, %v306_v24  ;;  %v360_v31 = vsel %vm359_vm0, %v354_v27, %v356_v19  ;;  %v561_v51 = vpop.permute.xlu2 %560  ;;  %v1317_v24 = vld [vmem:[%s1715_s1 + $0x20] sm:$0xf] }
  0x99   : > { %v316_v32 = vsel %vm314_vm1, %v308_v29, 0  ;;  %v319_v33 = vsel %vm314_vm1, %v309_v30, 0  ;;  %v366_v34 = vsel %vm314_vm1, %v360_v31, 0 }
  0x9a   : > { %328 = vmatpush.bf16.msra.mxu0 %v316_v32  ;;  %341 = vmatpush.bf16.msra.mxu1 %v319_v33 }
  0x9b   : > { %378 = vmatpush.bf16.msra.mxu2 %v366_v34 }
  0x9d   : > { %1294 = vmatmul.msk.bf16.vlgmr.msra.gmra.mxu0 %vm310_vm2, %v292_v35  ;;  %1295 = vmatmul.msk.bf16.vlgmr.msra.gmra.mxu1 %vm310_vm2, %v292_v35 }
  0x9e   : > { %1297 = vmatmul.msk.bf16.vlgmr.msra.gmra.mxu2 %vm310_vm2, %v1296_v23  ;;  %v1314_v23 = vld [vmem:[%s1715_s1 + $0x1c] sm:$0xf] }
  0x9f   : > { %v404_v36 = vpop.permute.xlu1 %403  ;;  %v402_v37 = vpop.permute.xlu0 %401 }
  0xa0   : > { %v408_v38 = vsel %vm407_vm4, %v402_v37, %v404_v36  ;;  %v409_v39 = vsel %vm407_vm4, %v404_v36, %v406_v26  ;;  %v611_v60 = vpop.permute.xlu2 %610 }
  0xa1   : > { %v414_v43 = vsel %vm314_vm1, %v408_v38, 0  ;;  %v417_v44 = vsel %vm314_vm1, %v409_v39, 0 }
  0xa2   : > { %426 = vmatpush.bf16.msrb.mxu0 %v414_v43  ;;  %439 = vmatpush.bf16.msrb.mxu1 %v417_v44 }
  0xa6   : > { %523 = vmatpush.bf16.msra.mxu0 %v511_v40  ;;  %536 = vmatpush.bf16.msra.mxu1 %v514_v41 }
  0xa7   : > { %v454_v45 = vpop.permute.xlu1 %453  ;;  %v452_v46 = vpop.permute.xlu0 %451 }
  0xa8   : > { %v458_v47 = vsel %vm457_vm5, %v452_v46, %v454_v45  ;;  %v459_v48 = vsel %vm457_vm5, %v454_v45, %v456_v42  ;;  %v661_v7 = vpop.permute.xlu2 %660 }
  0xa9   : > { %v464_v49 = vsel %vm314_vm1, %v458_v47, 0  ;;  %v467_v50 = vsel %vm314_vm1, %v459_v48, 0  ;;  %v1557_v47 = vld [vmem:[%s1719_s5 + $0x8] sm:$0xff] }
  0xaa   : > { %476 = vmatpush.bf16.msrb.mxu2 %v464_v49  ;;  %489 = vmatpush.bf16.msrb.mxu3 %v467_v50  ;;  %v1562_v50 = vld [vmem:[%s1719_s5] sm:$0xff] }
  0xad   : > { %1300 = vmatmul.msk.bf16.vlgmr.msrb.gmra.mxu0 %vm310_vm2, %v1299_v52  ;;  %1301 = vmatmul.msk.bf16.vlgmr.msrb.gmra.mxu1 %vm310_vm2, %v1299_v52  ;;  %v1572_v52 = vld [vmem:[%s1720_s6 + $0x8] sm:$0xff] }
  0xae   : > { %1303 = vmatmul.msk.bf16.vlgmr.msrb.gmra.mxu2 %vm310_vm2, %v1302_v53  ;;  %1304 = vmatmul.msk.bf16.vlgmr.msrb.gmra.mxu3 %vm310_vm2, %v1302_v53 }
  0xaf   : > { %v559_v54 = vpop.permute.xlu1 %558  ;;  %v557_v55 = vpop.permute.xlu0 %556 }
  0xb0   : > { %v564_v56 = vsel %vm562_vm6, %v559_v54, %v561_v51  ;;  %v563_v57 = vsel %vm562_vm6, %v557_v55, %v559_v54  ;;  %v709_v15 = vpop.permute.xlu2 %708  ;;  %v1567_v51 = vld [vmem:[%s1720_s6] sm:$0xff] }
  0xb1   : > { %v572_v58 = vsel %vm314_vm1, %v564_v56, 0  ;;  %v569_v59 = vsel %vm314_vm1, %v563_v57, 0 }
  0xb2   : > { %581 = vmatpush.bf16.msra.mxu2 %v569_v59  ;;  %594 = vmatpush.bf16.msra.mxu3 %v572_v58 }
  0xb7   : > { %v609_v61 = vpop.permute.xlu1 %608  ;;  %v607_v62 = vpop.permute.xlu0 %606 }
  0xb8   : > { %v614_v63 = vsel %vm612_vm7, %v609_v61, %v611_v60  ;;  %v613_v0 = vsel %vm612_vm7, %v607_v62, %v609_v61 }
  0xb9   : > { %v622_v3 = vsel %vm314_vm1, %v614_v63, 0  ;;  %v619_v4 = vsel %vm314_vm1, %v613_v0, 0 }
  0xba   : > { %631 = vmatpush.bf16.msrb.mxu0 %v619_v4  ;;  %644 = vmatpush.bf16.msrb.mxu1 %v622_v3 }
  0xbd   : > { %1306 = vmatmul.msk.bf16.vlgmr.msra.gmra.mxu0 %vm310_vm2, %v1305_v5  ;;  %1307 = vmatmul.msk.bf16.vlgmr.msra.gmra.mxu1 %vm310_vm2, %v1305_v5 }
  0xbe   : > { %1309 = vmatmul.msk.bf16.vlgmr.msra.gmra.mxu2 %vm310_vm2, %v1308_v6  ;;  %1310 = vmatmul.msk.bf16.vlgmr.msra.gmra.mxu3 %vm310_vm2, %v1308_v6 }
  0xbf   : > { %v659_v9 = vpop.permute.xlu1 %658  ;;  %v657_v10 = vpop.permute.xlu0 %656 }
  0xc0   : > { %v664_v11 = vsel %vm662_vm8, %v659_v9, %v661_v7  ;;  %v663_v12 = vsel %vm662_vm8, %v657_v10, %v659_v9 }
  0xc1   : > { %v672_v13 = vsel %vm314_vm1, %v664_v11, 0  ;;  %v669_v14 = vsel %vm314_vm1, %v663_v12, 0 }
  0xc2   : > { %681 = vmatpush.bf16.msrb.mxu2 %v669_v14  ;;  %694 = vmatpush.bf16.msrb.mxu3 %v672_v13 }
  0xc7   : > { %v707_v16 = vpop.permute.xlu1 %706  ;;  %v705_v17 = vpop.permute.xlu0 %704 }
  0xc8   : > { %v712_v18 = vsel %vm710_vm9, %v707_v16, %v709_v15  ;;  %v711_v19 = vsel %vm710_vm9, %v705_v17, %v707_v16 }
  0xc9   : > { %v720_v20 = vsel %vm314_vm1, %v712_v18, 0  ;;  %v717_v21 = vsel %vm314_vm1, %v711_v19, 0 }
  0xca   : > { %729 = vmatpush.bf16.msra.mxu0 %v717_v21  ;;  %742 = vmatpush.bf16.msra.mxu1 %v720_v20 }
  0xcd   : > { %1312 = vmatmul.msk.bf16.vlgmr.msrb.gmra.mxu0 %vm310_vm2, %v1311_v22  ;;  %1313 = vmatmul.msk.bf16.vlgmr.msrb.gmra.mxu1 %vm310_vm2, %v1311_v22 }
  0xce   : > { %1315 = vmatmul.msk.bf16.vlgmr.msrb.gmra.mxu2 %vm310_vm2, %v1314_v23  ;;  %1316 = vmatmul.msk.bf16.vlgmr.msrb.gmra.mxu3 %vm310_vm2, %v1314_v23 }
  0xdd   : > { %1318 = vmatmul.msk.bf16.vlgmr.msra.gmra.mxu0 %vm310_vm2, %v1317_v24  ;;  %1319 = vmatmul.msk.bf16.vlgmr.msra.gmra.mxu1 %vm310_vm2, %v1317_v24 }
 0x109   : > { %v393_v25 = vpop.f32.mrf.mxu3 }
 0x111   : > { %v395_v26 = vpop.f32.mrf.mxu3 }
 0x11a   : > { %v330_v27 = vpop.f32.mrf.mxu0  ;;  %v343_v28 = vpop.f32.mrf.mxu1 }
 0x11b   : > { %v348_v55 = vmul.f32 %v343_v28, %v1557_v47  ;;  %v347_v56 = vmul.f32 %v330_v27, %v1562_v50  ;;  %v756_v27 = vpop.permute.xlu0 %755 }
 0x11d   : > { %v398_v59 = vadd.f32 %v393_v25, %v348_v55 }
 0x121   : > { %v380_v29 = vpop.f32.mrf.mxu2 }
 0x122   : > { %v332_v30 = vpop.f32.mrf.mxu0  ;;  %v345_v31 = vpop.f32.mrf.mxu1  ;;  %v397_v60 = vadd.f32 %v380_v29, %v347_v56 }
 0x129   : > { %v382_v32 = vpop.f32.mrf.mxu2 }
 0x12a   : > { %v428_v33 = vpop.f32.mrf.mxu0  ;;  %v441_v34 = vpop.f32.mrf.mxu1 }
 0x12b   : > { %v445_v57 = vmul.f32 %v428_v33, %v1567_v51  ;;  %v446_v58 = vmul.f32 %v441_v34, %v1572_v52 }
 0x12d   : > { %v447_v63 = vadd.f32 %v445_v57, %v397_v60  ;;  %v448_v0 = vadd.f32 %v446_v58, %v398_v59 }
 0x131   : > { %v478_v35 = vpop.f32.mrf.mxu2  ;;  %v491_v36 = vpop.f32.mrf.mxu3 }
 0x132   : > { %v430_v37 = vpop.f32.mrf.mxu0  ;;  %v443_v38 = vpop.f32.mrf.mxu1  ;;  %v495_v61 = vmul.f32 %v478_v35, %v1562_v50  ;;  %v496_v62 = vmul.f32 %v491_v36, %v1557_v47 }
 0x134   : > { %v497_v7 = vadd.f32 %v495_v61, %v447_v63  ;;  %v498_v8 = vadd.f32 %v496_v62, %v448_v0  ;;  %v768_v0 = vld [vmem:[%s1717_s3] sm:$0xf] }
 0x139   : > { %v480_v39 = vpop.f32.mrf.mxu2  ;;  %v493_v40 = vpop.f32.mrf.mxu3 }
 0x13a   : > { %v525_v41 = vpop.f32.mrf.mxu0  ;;  %v538_v42 = vpop.f32.mrf.mxu1 }
 0x13b   : > { %v542_v11 = vadd.f32 %v525_v41, %v497_v7  ;;  %v543_v12 = vadd.f32 %v538_v42, %v498_v8 }
 0x141   : > { %v583_v43 = vpop.f32.mrf.mxu2  ;;  %v596_v44 = vpop.f32.mrf.mxu3 }
 0x142   : > { %v527_v45 = vpop.f32.mrf.mxu0  ;;  %v540_v46 = vpop.f32.mrf.mxu1  ;;  %v600_v9 = vmul.f32 %v583_v43, %v1567_v51  ;;  %v601_v10 = vmul.f32 %v596_v44, %v1572_v52 }
 0x144   : > { %v602_v15 = vadd.f32 %v600_v9, %v542_v11  ;;  %v603_v16 = vadd.f32 %v601_v10, %v543_v12  ;;  %v1322_v11 = vld [vmem:[%s1717_s3 + $0x4] sm:$0xf] }
 0x149   : > { %v585_v48 = vpop.f32.mrf.mxu2  ;;  %v598_v49 = vpop.f32.mrf.mxu3 }
 0x14a   : > { %v633_v53 = vpop.f32.mrf.mxu0  ;;  %v646_v54 = vpop.f32.mrf.mxu1 }
 0x14b   : > { %v650_v13 = vmul.f32 %v633_v53, %v1562_v50  ;;  %v651_v14 = vmul.f32 %v646_v54, %v1557_v47 }
 0x14d   : > { %v652_v17 = vadd.f32 %v650_v13, %v602_v15  ;;  %v653_v18 = vadd.f32 %v651_v14, %v603_v16 }
 0x151   : > { %v683_v3 = vpop.f32.mrf.mxu2  ;;  %v696_v4 = vpop.f32.mrf.mxu3 }
 0x152   : > { %v635_v5 = vpop.f32.mrf.mxu0  ;;  %v648_v6 = vpop.f32.mrf.mxu1  ;;  %v700_v23 = vadd.f32 %v683_v3, %v652_v17  ;;  %v701_v24 = vadd.f32 %v696_v4, %v653_v18 }
 0x159   : > { %v685_v19 = vpop.f32.mrf.mxu2  ;;  %v698_v20 = vpop.f32.mrf.mxu3 }
 0x15a   : > { %v731_v21 = vpop.f32.mrf.mxu0  ;;  %v744_v22 = vpop.f32.mrf.mxu1  ;;  %v1325_v20 = vld [vmem:[%s1717_s3 + $0x8] sm:$0xf] }
 0x15b   : > { %v748_v25 = vmul.f32 %v731_v21, %v1567_v51  ;;  %v749_v26 = vmul.f32 %v744_v22, %v1572_v52 }
 0x15d   : > { %v750_v28 = vadd.f32 %v748_v25, %v700_v23  ;;  %v751_v29 = vadd.f32 %v749_v26, %v701_v24 }
 0x15f   : > { %v758_v30 = vadd.f32 %v756_v27, %v750_v28  ;;  %v759_v31 = vadd.f32 %v756_v27, %v751_v29  ;;  %v1328_v27 = vld [vmem:[%s1717_s3 + $0xc] sm:$0xf] }
 0x161   : > { %v760_v32 = vmax.f32 %v758_v30, 0.0  ;;  %v761_v33 = vmax.f32 %v759_v31, 0.0 }
 0x162   : > { %v733_v34 = vpop.f32.mrf.mxu0  ;;  %v746_v35 = vpop.f32.mrf.mxu1 }
 0x163   : > { %v764_v36 = vpack.c.bf16 %v761_v33, %v760_v32  ;;  %v1331_v35 = vld [vmem:[%s1717_s3 + $0x10] sm:$0xf] }
 0x165   : > { %765 = vst [vmem:[#allocation3 + $0x4] sm:$0xff] %v764_v36  ;;  %v1021_v45 = vunpack.c.h.b16 %v764_v36  ;;  %v1020_v48 = vunpack.c.l.b16 %v764_v36 }
 0x167   : > { %v1024_v46 = vpack.c.b16 %v1021_v45, %v1021_v45  ;;  %v1023_v49 = vpack.c.b16 %v1020_v48, %v1020_v48 }
 0x169   : > { %v981_v3 = vsel %vm314_vm1, %v1023_v49, 0  ;;  %v984_v19 = vsel %vm314_vm1, %v1024_v46, 0 }
 0x16c   : > { %v766_v37 = vld [vmem:[#allocation3] sm:$0xff]  ;;  %v767_v42 = vld [vmem:[#allocation3 + $0x8] sm:$0xff]  }
 0x16d   : > { %v772_v38 = vunpack.c.h.b16 %v766_v37  ;;  %v771_v39 = vunpack.c.l.b16 %v766_v37  ;;  %v773_v43 = vunpack.c.l.b16 %v767_v42  ;;  %v1022_v53 = vunpack.c.h.b16 %v767_v42 }
 0x16f   : > { %v775_v40 = vpack.c.b16 %v772_v38, %v772_v38  ;;  %v774_v41 = vpack.c.b16 %v771_v39, %v771_v39  ;;  %v776_v44 = vpack.c.b16 %v773_v43, %v773_v43  ;;  %v1025_v54 = vpack.c.b16 %v1022_v53, %v1022_v53  ;;  %v1334_v43 = vld [vmem:[%s1717_s3 + $0x14] sm:$0xf] }
 0x171   : > { %875 = vrot.lane.b32.xlu0 %v775_v40, %s1380_s9  ;;  %779 = vrot.lane.b32.xlu2 %v775_v40, %s1378_s30 }
 0x172   : > { %777 = vrot.lane.b32.xlu1 %v774_v41, %s1378_s30 }
 0x179   : > { %828 = vrot.lane.b32.xlu0 %v775_v40, %s1379_s8  ;;  %873 = vrot.lane.b32.xlu2 %v774_v41, %s1380_s9 }
 0x17a   : > { %781 = vrot.lane.b32.xlu1 %v776_v44, %s1378_s30 }
 0x181   : > { %924 = vrot.lane.b32.xlu0 %v775_v40, %s1381_s10  ;;  %826 = vrot.lane.b32.xlu2 %v774_v41, %s1379_s8 }
 0x182   : > { %877 = vrot.lane.b32.xlu1 %v776_v44, %s1380_s9  ;;  %s278_s9 = scalar_lea.vmem %s1721_s7, %s1348_s26 }
 0x189   : > { %1077 = vrot.lane.b32.xlu0 %v1024_v46, %s1383_s12  ;;  %922 = vrot.lane.b32.xlu2 %v774_v41, %s1381_s10 }
 0x18a   : > { %830 = vrot.lane.b32.xlu1 %v776_v44, %s1379_s8 }
 0x191   : > { %1028 = vrot.lane.b32.xlu0 %v1024_v46, %s1382_s11  ;;  %1075 = vrot.lane.b32.xlu2 %v1023_v49, %s1383_s12 }
 0x192   : > { %926 = vrot.lane.b32.xlu1 %v776_v44, %s1381_s10  ;;  %v1218_v44 = vld [vmem:[%s1718_s4] sm:$0xff] }
 0x199   : > { %1173 = vrot.lane.b32.xlu0 %v1024_v46, %s1385_s14  ;;  %1026 = vrot.lane.b32.xlu2 %v1023_v49, %s1382_s11 }
 0x19a   : > { %1079 = vrot.lane.b32.xlu1 %v1025_v54, %s1383_s12 }
 0x1a1   : > { %1126 = vrot.lane.b32.xlu0 %v1024_v46, %s1384_s13  ;;  %1171 = vrot.lane.b32.xlu2 %v1023_v49, %s1385_s14 }
 0x1a2   : > { %1030 = vrot.lane.b32.xlu1 %v1025_v54, %s1382_s11 }
 0x1a9   : > { %1124 = vrot.lane.b32.xlu2 %v1023_v49, %s1384_s13 }
 0x1aa   : > { %1175 = vrot.lane.b32.xlu1 %v1025_v54, %s1385_s14 }
 0x1b1   : > { %1221 = vperm.xlu2 %1368, %v1218_v44  }
 0x1b2   : > { %1128 = vrot.lane.b32.xlu1 %v1025_v54, %s1384_s13 }
 0x1cb   : > { %v780_v55 = vpop.permute.xlu2 %779 }
 0x1d3   : > { %v874_v56 = vpop.permute.xlu2 %873 }
 0x1db   : > { %v827_v57 = vpop.permute.xlu2 %826 }
 0x1e3   : > { %v876_v58 = vpop.permute.xlu0 %875  ;;  %v923_v4 = vpop.permute.xlu2 %922 }
 0x1e4   : > { %v879_v59 = vsel %vm407_vm4, %v874_v56, %v876_v58  ;;  %v778_v60 = vpop.permute.xlu1 %777  ;;  %v1337_v56 = vld [vmem:[%s1717_s3 + $0x18] sm:$0xf] }
 0x1e5   : > { %v885_v61 = vsel %vm314_vm1, %v879_v59, 0  ;;  %v783_v62 = vsel %vm307_vm3, %v778_v60, %v780_v55  ;;  %v1340_v60 = vld [vmem:[%s1717_s3 + $0x1c] sm:$0xf] }
 0x1e6   : > { %v789_v63 = vsel %vm314_vm1, %v783_v62, 0 }
 0x1e7   : > { %801 = vmatpush.bf16.msra.mxu2 %v789_v63 }
 0x1ea   : > { %1320 = vmatmul.msk.bf16.vlgmr.msra.gmra.mxu2 %vm310_vm2, %v768_v0 }
 0x1eb   : > { %897 = vmatpush.bf16.msrb.mxu2 %v885_v61  ;;  %v829_v5 = vpop.permute.xlu0 %828  ;;  %v1076_v15 = vpop.permute.xlu2 %1075 }
 0x1ec   : > { %v832_v6 = vsel %vm359_vm0, %v827_v57, %v829_v5  ;;  %v782_v7 = vpop.permute.xlu1 %781 }
 0x1ed   : > { %v838_v8 = vsel %vm314_vm1, %v832_v6, 0  ;;  %v784_v9 = vsel %vm307_vm3, %v780_v55, %v782_v7 }
 0x1ee   : > { %v792_v10 = vsel %vm314_vm1, %v784_v9, 0  ;;  %850 = vmatpush.bf16.msrb.mxu0 %v838_v8 }
 0x1ef   : > { %993 = vmatpush.bf16.msra.mxu2 %v981_v3  ;;  %814 = vmatpush.bf16.msra.mxu3 %v792_v10 }
 0x1f1   : > { %1323 = vmatmul.msk.bf16.vlgmr.msrb.gmra.mxu0 %vm310_vm2, %v1322_v11 }
 0x1f2   : > { %1321 = vmatmul.msk.bf16.vlgmr.msra.gmra.mxu3 %vm310_vm2, %v768_v0  ;;  %v1343_v0 = vld [vmem:[%s1717_s3 + $0x20] sm:$0xf] }
 0x1f3   : > { %v925_v12 = vpop.permute.xlu0 %924  ;;  %v1027_v28 = vpop.permute.xlu2 %1026 }
 0x1f4   : > { %v928_v13 = vsel %vm457_vm5, %v923_v4, %v925_v12  ;;  %v878_v14 = vpop.permute.xlu1 %877 }
 0x1f5   : > { %v934_v16 = vsel %vm314_vm1, %v928_v13, 0  ;;  %v880_v17 = vsel %vm407_vm4, %v876_v58, %v878_v14 }
 0x1f6   : > { %v888_v18 = vsel %vm314_vm1, %v880_v17, 0  ;;  %946 = vmatpush.bf16.msra.mxu0 %v934_v16 }
 0x1f7   : > { %910 = vmatpush.bf16.msrb.mxu3 %v888_v18 }
 0x1fa   : > { %1326 = vmatmul.msk.bf16.vlgmr.msrb.gmra.mxu2 %vm310_vm2, %v1325_v20 }
 0x1fb   : > { %1006 = vmatpush.bf16.msra.mxu3 %v984_v19  ;;  %v1078_v21 = vpop.permute.xlu0 %1077  ;;  %v1172_v36 = vpop.permute.xlu2 %1171 }
 0x1fc   : > { %v1081_v22 = vsel %vm612_vm7, %v1076_v15, %v1078_v21  ;;  %v831_v23 = vpop.permute.xlu1 %830 }
 0x1fd   : > { %v1087_v24 = vsel %vm314_vm1, %v1081_v22, 0  ;;  %v833_v25 = vsel %vm359_vm0, %v829_v5, %v831_v23 }
 0x1fe   : > { %v841_v26 = vsel %vm314_vm1, %v833_v25, 0  ;;  %1099 = vmatpush.bf16.msrb.mxu2 %v1087_v24 }
 0x1ff   : > { %863 = vmatpush.bf16.msrb.mxu1 %v841_v26 }
 0x201   : > { %1329 = vmatmul.msk.bf16.vlgmr.msra.gmra.mxu0 %vm310_vm2, %v1328_v27 }
 0x202   : > { %1324 = vmatmul.msk.bf16.vlgmr.msrb.gmra.mxu1 %vm310_vm2, %v1322_v11  ;;  %1327 = vmatmul.msk.bf16.vlgmr.msrb.gmra.mxu3 %vm310_vm2, %v1325_v20 }
 0x203   : > { %v1029_v29 = vpop.permute.xlu0 %1028  ;;  %v1125_v45 = vpop.permute.xlu2 %1124 }
 0x204   : > { %v1032_v30 = vsel %vm562_vm6, %v1027_v28, %v1029_v29  ;;  %v927_v31 = vpop.permute.xlu1 %926 }
 0x205   : > { %v1038_v32 = vsel %vm314_vm1, %v1032_v30, 0  ;;  %v929_v33 = vsel %vm457_vm5, %v925_v12, %v927_v31 }
 0x206   : > { %v937_v34 = vsel %vm314_vm1, %v929_v33, 0  ;;  %1050 = vmatpush.bf16.msrb.mxu0 %v1038_v32 }
 0x207   : > { %959 = vmatpush.bf16.msra.mxu1 %v937_v34 }
 0x20a   : > { %1332 = vmatmul.msk.bf16.vlgmr.msra.gmra.mxu2 %vm310_vm2, %v1331_v35 }
 0x20b   : > { %v1174_v37 = vpop.permute.xlu0 %1173 }
 0x20c   : > { %v1177_v38 = vsel %vm710_vm9, %v1172_v36, %v1174_v37  ;;  %v1080_v39 = vpop.permute.xlu1 %1079 }
 0x20d   : > { %v1183_v40 = vsel %vm314_vm1, %v1177_v38, 0  ;;  %v1082_v41 = vsel %vm612_vm7, %v1078_v21, %v1080_v39 }
 0x20e   : > { %v1090_v42 = vsel %vm314_vm1, %v1082_v41, 0  ;;  %1195 = vmatpush.bf16.msra.mxu2 %v1183_v40 }
 0x20f   : > { %1112 = vmatpush.bf16.msrb.mxu3 %v1090_v42 }
 0x211   : > { %1335 = vmatmul.msk.bf16.vlgmr.msrb.gmra.mxu0 %vm310_vm2, %v1334_v43 }
 0x212   : > { %1330 = vmatmul.msk.bf16.vlgmr.msra.gmra.mxu1 %vm310_vm2, %v1328_v27  ;;  %1333 = vmatmul.msk.bf16.vlgmr.msra.gmra.mxu3 %vm310_vm2, %v1331_v35 }
 0x213   : > { %v1127_v46 = vpop.permute.xlu0 %1126 }
 0x214   : > { %v1130_v48 = vsel %vm662_vm8, %v1125_v45, %v1127_v46  ;;  %v1031_v49 = vpop.permute.xlu1 %1030 }
 0x215   : > { %v1136_v53 = vsel %vm314_vm1, %v1130_v48, 0  ;;  %v1033_v54 = vsel %vm562_vm6, %v1029_v29, %v1031_v49 }
 0x216   : > { %v1041_v55 = vsel %vm314_vm1, %v1033_v54, 0  ;;  %1148 = vmatpush.bf16.msra.mxu0 %v1136_v53 }
 0x217   : > { %1063 = vmatpush.bf16.msrb.mxu1 %v1041_v55 }
 0x21a   : > { %1338 = vmatmul.msk.bf16.vlgmr.msrb.gmra.mxu2 %vm310_vm2, %v1337_v56 }
 0x21c   : > { %v1176_v57 = vpop.permute.xlu1 %1175 }
 0x21d   : > { %v1178_v58 = vsel %vm710_vm9, %v1174_v37, %v1176_v57 }
 0x21e   : > { %v1186_v59 = vsel %vm314_vm1, %v1178_v58, 0  ;;  %v1222_v58 = vpop.permute.xlu2 %1221 }
 0x21f   : > { %1208 = vmatpush.bf16.msra.mxu3 %v1186_v59 }
 0x221   : > { %1341 = vmatmul.msk.bf16.vlgmr.msra.gmra.mxu0 %vm310_vm2, %v1340_v60 }
 0x222   : > { %1336 = vmatmul.msk.bf16.vlgmr.msrb.gmra.mxu1 %vm310_vm2, %v1334_v43  ;;  %1339 = vmatmul.msk.bf16.vlgmr.msrb.gmra.mxu3 %vm310_vm2, %v1337_v56 }
 0x224   : > { %v1129_v61 = vpop.permute.xlu1 %1128 }
 0x225   : > { %v1131_v62 = vsel %vm662_vm8, %v1127_v46, %v1129_v61 }
 0x226   : > { %v1139_v63 = vsel %vm314_vm1, %v1131_v62, 0 }
 0x227   : > { %1161 = vmatpush.bf16.msra.mxu1 %v1139_v63 }
 0x22a   : > { %1344 = vmatmul.msk.bf16.vlgmr.msra.gmra.mxu2 %vm310_vm2, %v1343_v0 }
 0x232   : > { %1342 = vmatmul.msk.bf16.vlgmr.msra.gmra.mxu1 %vm310_vm2, %v1340_v60  ;;  %1345 = vmatmul.msk.bf16.vlgmr.msra.gmra.mxu3 %vm310_vm2, %v1343_v0 }
 0x26d   : > { %v803_v3 = vpop.f32.mrf.mxu2 }
 0x26e   : > { %v852_v4 = vpop.f32.mrf.mxu0  ;;  %v820_v24 = vmul.f32 %v803_v3, %v1562_v50 }
 0x270   : > { %v869_v28 = vadd.f32 %v852_v4, %v820_v24 }
 0x275   : > { %v805_v5 = vpop.f32.mrf.mxu2  ;;  %v816_v6 = vpop.f32.mrf.mxu3 }
 0x276   : > { %v854_v7 = vpop.f32.mrf.mxu0  ;;  %v821_v41 = vmul.f32 %v816_v6, %v1557_v47 }
 0x27d   : > { %v818_v8 = vpop.f32.mrf.mxu3  ;;  %v899_v9 = vpop.f32.mrf.mxu2 }
 0x27e   : > { %v948_v10 = vpop.f32.mrf.mxu0  ;;  %v916_v25 = vmul.f32 %v899_v9, %v1567_v51 }
 0x27f   : > { %v865_v11 = vpop.f32.mrf.mxu1  ;;  %v965_v32 = vmul.f32 %v948_v10, %v1562_v50 }
 0x280   : > { %v918_v31 = vadd.f32 %v916_v25, %v869_v28  ;;  %v870_v44 = vadd.f32 %v865_v11, %v821_v41 }
 0x282   : > { %v967_v33 = vadd.f32 %v965_v32, %v918_v31 }
 0x285   : > { %v901_v12 = vpop.f32.mrf.mxu2  ;;  %v912_v13 = vpop.f32.mrf.mxu3 }
 0x286   : > { %v950_v14 = vpop.f32.mrf.mxu0  ;;  %v917_v42 = vmul.f32 %v912_v13, %v1572_v52 }
 0x287   : > { %v867_v15 = vpop.f32.mrf.mxu1 }
 0x288   : > { %v919_v48 = vadd.f32 %v917_v42, %v870_v44 }
 0x28d   : > { %v914_v16 = vpop.f32.mrf.mxu3  ;;  %v995_v17 = vpop.f32.mrf.mxu2 }
 0x28e   : > { %v1052_v18 = vpop.f32.mrf.mxu0  ;;  %v1012_v37 = vadd.f32 %v995_v17, %v967_v33 }
 0x28f   : > { %v961_v19 = vpop.f32.mrf.mxu1  ;;  %v1069_v34 = vmul.f32 %v1052_v18, %v1567_v51 }
 0x290   : > { %v966_v45 = vmul.f32 %v961_v19, %v1557_v47 }
 0x291   : > { %v1071_v43 = vadd.f32 %v1069_v34, %v1012_v37 }
 0x292   : > { %v968_v54 = vadd.f32 %v966_v45, %v919_v48 }
 0x295   : > { %v997_v20 = vpop.f32.mrf.mxu2  ;;  %v1008_v21 = vpop.f32.mrf.mxu3 }
 0x296   : > { %v1054_v22 = vpop.f32.mrf.mxu0  ;;  %v1013_v59 = vadd.f32 %v1008_v21, %v968_v54 }
 0x297   : > { %v963_v23 = vpop.f32.mrf.mxu1 }
 0x29d   : > { %v1010_v26 = vpop.f32.mrf.mxu3  ;;  %v1101_v27 = vpop.f32.mrf.mxu2 }
 0x29e   : > { %v1150_v29 = vpop.f32.mrf.mxu0  ;;  %v1118_v38 = vmul.f32 %v1101_v27, %v1562_v50 }
 0x29f   : > { %v1065_v30 = vpop.f32.mrf.mxu1 }
 0x2a0   : > { %v1120_v46 = vadd.f32 %v1118_v38, %v1071_v43  ;;  %v1070_v55 = vmul.f32 %v1065_v30, %v1572_v52 }
 0x2a2   : > { %v1167_v56 = vadd.f32 %v1150_v29, %v1120_v46  ;;  %v1072_v62 = vadd.f32 %v1070_v55, %v1013_v59 }
 0x2a5   : > { %v1103_v35 = vpop.f32.mrf.mxu2  ;;  %v1114_v36 = vpop.f32.mrf.mxu3 }
 0x2a6   : > { %v1152_v39 = vpop.f32.mrf.mxu0  ;;  %v1119_v60 = vmul.f32 %v1114_v36, %v1557_v47 }
 0x2a7   : > { %v1067_v40 = vpop.f32.mrf.mxu1 }
 0x2a8   : > { %v1121_v0 = vadd.f32 %v1119_v60, %v1072_v62 }
 0x2ad   : > { %v1116_v49 = vpop.f32.mrf.mxu3  ;;  %v1197_v53 = vpop.f32.mrf.mxu2 }
 0x2ae   : > { %v1214_v50 = vmul.f32 %v1197_v53, %v1567_v51 }
 0x2af   : > { %v1163_v57 = vpop.f32.mrf.mxu1 }
 0x2b0   : > { %v1216_v61 = vadd.f32 %v1214_v50, %v1167_v56  ;;  %v1168_v6 = vadd.f32 %v1163_v57, %v1121_v0 }
 0x2b2   : > { %v1224_v63 = vadd.f32 %v1222_v58, %v1216_v61 }
 0x2b4   : > { %v1226_v3 = vadd.f32 %v1224_v63, %v1442_v1 }
 0x2b5   : > { %v1210_v4 = vpop.f32.mrf.mxu3  ;;  %v1199_v5 = vpop.f32.mrf.mxu2 }
 0x2b6   : > { %1228 = vst [vmem:[%s278_s9] sm:$0xff] %v1226_v3  ;;  %v1215_v51 = vmul.f32 %v1210_v4, %v1572_v52 }
 0x2b7   : > { %v1165_v7 = vpop.f32.mrf.mxu1 }
 0x2b8   : > { %v1217_v8 = vadd.f32 %v1215_v51, %v1168_v6 }
 0x2ba   : > { %v1225_v47 = vadd.f32 %v1222_v58, %v1217_v8 }
 0x2bc   : > { %v1227_v9 = vadd.f32 %v1225_v47, %v1444_v2 }
 0x2bd   : > { %v1212_v10 = vpop.f32.mrf.mxu3 }
 0x2be   : > { %1229 = vst [vmem:[%s278_s9 + $0x8] sm:$0xff] %v1227_v9 }
 0x2bf PF: > { %s17_s24 = sadd.s32 1, %s1375_s24  }
 0x2c0   : > { %p14_p4 = scmp.ge.s32.totalorder %s17_s24, 4  }
 0x2c2   :  { %16 = sbr.rel (!%p14_p4) target bundleno = 1 (0x1), region = 94 }

</bundles_post_ra>
